<compile_context>
chip_gen: v5e
topology: v5e:2x2
jax: 0.10.0
libtpu: 0.0.40
codegen_flags: <defaults>
</compile_context>

<pallas_src>
import math
import functools

import jax
import jax.numpy as jnp
from jax.experimental import pallas as pl
from jax.experimental.pallas import tpu as pltpu


# ----------------------------- kernel bodies -------------------------------


def _emit(x_ref, pe_ref, o_ref, transform, *, batch, d, chunked):
    """out[:, chunk] = transform(x[:, chunk] + pe, chunk) for each lane chunk."""
    pe = pe_ref[...]                          # (ts, D), already x.dtype
    if chunked:
        # Static unrolled loop over batch; each chunk is a lane-aligned D-wide
        # slice (D % 128 == 0), so no (ts, B*D) pe temp is materialized.
        for b in range(batch):
            sl = pl.ds(b * d, d)
            o_ref[:, sl] = transform(x_ref[:, sl] + pe, sl).astype(o_ref.dtype)
    else:
        y = x_ref[...] + jnp.tile(pe, (1, batch))
        o_ref[...] = transform(y, slice(None)).astype(o_ref.dtype)


def _kernel_eval(x_ref, pe_ref, o_ref, *, batch, d, chunked):
    _emit(x_ref, pe_ref, o_ref, lambda y, sl: y, batch=batch, d=d, chunked=chunked)


def _kernel_train_tpuprng(seed_ref, x_ref, pe_ref, o_ref, *, batch, d, chunked,
                          thr, scale):
    # Fold (seed, tile index) into the PRNG state -> decorrelated per-tile streams.
    pltpu.prng_seed(seed_ref[0], pl.program_id(0))

    def drop(y, sl):
        bits = pltpu.bitcast(pltpu.prng_random_bits(y.shape), jnp.uint32)
        keep = bits >= jnp.uint32(thr)        # pure integer threshold test
        return jnp.where(keep, y * jnp.asarray(scale, y.dtype),
                         jnp.zeros((), y.dtype))

    _emit(x_ref, pe_ref, o_ref, drop, batch=batch, d=d, chunked=chunked)


def _kernel_train_hostbits(x_ref, pe_ref, bits_ref, o_ref, *, batch, d, chunked,
                           thr, scale):
    # uint8 thresholds: keep-prob quantized to 1/256, but only 1/4 the extra
    # HBM read traffic of a uint32 bits stream in a bandwidth-bound kernel.
    def drop(y, sl):
        keep = bits_ref[:, sl] >= jnp.uint8(thr)
        return jnp.where(keep, y * jnp.asarray(scale, y.dtype),
                         jnp.zeros((), y.dtype))

    _emit(x_ref, pe_ref, o_ref, drop, batch=batch, d=d, chunked=chunked)


# ----------------------------- parameter setup -----------------------------


def make_positional_encoding(d_model, max_len=5000):
    """Replicates the PyTorch __init__ buffer (batch_first=False layout)."""
    position = jnp.arange(max_len, dtype=jnp.float32)[:, None]            # (L, 1)
    div_term = jnp.exp(
        jnp.arange(0, d_model, 2, dtype=jnp.float32) * (-math.log(10000.0) / d_model)
    )
    pe = jnp.zeros((max_len, d_model), dtype=jnp.float32)
    pe = pe.at[:, 0::2].set(jnp.sin(position * div_term))
    if d_model % 2 == 0:
        pe = pe.at[:, 1::2].set(jnp.cos(position * div_term))
    else:
        pe = pe.at[:, 1::2].set(jnp.cos(position * div_term)[:, :-1])
    return pe[:, None, :]   # (max_len, 1, d_model)  <- pe.unsqueeze(0).transpose(0,1)


# ----------------------------- wrapper --------------------------------------


# Total per-step VMEM budget for all pipelined operands, per generation.
_VMEM_BUDGETS = {"v5": 12 << 20, "v6": 24 << 20, "v7": 36 << 20}
_DEFAULT_BUDGET = 16 << 20


def _tpu_generation():
    try:
        dev = jax.devices()[0]
    except Exception:
        return None
    if dev.platform != "tpu":
        return None
    kind = dev.device_kind.lower()
    for tag in ("v7", "v6", "v5", "v4"):
        if tag in kind:
            return tag
    return None


def _pick_seq_tile(seq_len, per_row_bytes, budget_bytes):
    """Largest seq tile whose total double-buffered footprint fits the budget."""
    rows = max(8, budget_bytes // max(per_row_bytes, 1))
    if rows >= seq_len:
        return seq_len
    return max(8, (rows // 8) * 8)


def positional_encoding_forward(x, pe, *, p_drop=0.1, training=True, seed=0,
                                seq_tile=None, rng_key=None, use_tpu_prng=None,
                                donate_x=False):
    """forward(x) = dropout(x + pe[:S]) for batch_first=False; x: (S, B, D)."""
    # TODO(synk): batch_first=True layout (B, S, D) and return_enc_only are not
    # wired up; the PyTorch module defaults match what we implement.
    S, B, D = x.shape
    assert pe.shape[0] >= S and pe.shape[-1] == D
    BD = B * D

    x2d = x.reshape(S, BD)                                   # free, row-major
    # Pre-cast pe to x.dtype: fewer DMA bytes for bf16 x, no per-element cast.
    pe2d = pe.reshape(pe.shape[0], D).astype(x.dtype)

    apply_dropout = training and p_drop > 0.0
    if use_tpu_prng is None:
        # pltpu.prng_* only lowers on real TPU (Mosaic); elsewhere fall back to
        # host-generated random bits streamed in as a uint8 input.
        use_tpu_prng = jax.default_backend() == "tpu"
    hostbits = apply_dropout and not use_tpu_prng

    # Chunked per-batch store path only when chunks are lane-aligned and the
    # static unroll over batch stays small.
    chunked = (D % 128 == 0) and (1 < B <= 32)

    gen = _tpu_generation()
    budget = _VMEM_BUDGETS.get(gen, _DEFAULT_BUDGET)

    # Bytes per seq-row across ALL pipelined operands (double-buffered).
    itemsize = x2d.dtype.itemsize
    per_row = 4 * BD * itemsize                    # x (x2) + out (x2)
    per_row += 2 * D * pe2d.dtype.itemsize         # pe (x2)
    if hostbits:
        per_row += 2 * BD * 1                      # uint8 bits (x2)
    if not chunked:
        per_row += BD * itemsize                   # materialized tiled-pe temp

    ts = _pick_seq_tile(S, per_row, budget) if seq_tile is None else seq_tile
    ts = min(ts, S)
    if ts != S and ts % 8:
        ts = max(8, (ts // 8) * 8)
    grid = (pl.cdiv(S, ts),)

    # pe block's sublane dim must be a multiple of 8 or span the full array;
    # only in the tiny/ragged case (ts == S, S % 8 != 0) do we slice.
    if ts % 8 != 0:
        pe2d = pe2d[:S]

    # Explicit VMEM limit with headroom; keep under v7x's 64 MiB physical.
    vmem_limit = ts * per_row + (2 << 20)
    vmem_cap = (48 << 20) if gen == "v7" else (100 << 20)
    vmem_limit = int(min(max(vmem_limit, 16 << 20), vmem_cap))

    # thr is chosen so P(bits < thr) ~= p (exact to 2^-32 / 2^-8); for p == 1.0
    # a few elements may pass the keep test but scale == 0 zeroes them anyway.
    thr32 = min(int(round(p_drop * (1 << 32))), (1 << 32) - 1)
    thr8 = min(int(round(p_drop * 256)), 255)
    scale = 1.0 / (1.0 - p_drop) if p_drop < 1.0 else 0.0

    x_spec = pl.BlockSpec((ts, BD), lambda i: (i, 0))
    pe_spec = pl.BlockSpec((ts, D), lambda i: (i, 0))
    out_spec = pl.BlockSpec((ts, BD), lambda i: (i, 0))
    # NOTE: fully lane-dense stores need BD % 128 == 0 (typical transformer
    # dims); smaller models fall back to masked partial stores (still correct).

    if not apply_dropout:
        kernel = functools.partial(_kernel_eval, batch=B, d=D, chunked=chunked)
        inputs = (x2d, pe2d)
        in_specs = [x_spec, pe_spec]
        x_idx = 0
        bits_bytes = 0
    elif use_tpu_prng:
        kernel = functools.partial(_kernel_train_tpuprng, batch=B, d=D,
                                   chunked=chunked, thr=thr32, scale=scale)
        seed_arr = jnp.asarray([seed], dtype=jnp.int32)
        inputs = (seed_arr, x2d, pe2d)
        in_specs = [pl.BlockSpec(memory_space=pltpu.MemorySpace.SMEM),
                    x_spec, pe_spec]
        x_idx = 1
        bits_bytes = 0
    else:
        kernel = functools.partial(_kernel_train_hostbits, batch=B, d=D,
                                   chunked=chunked, thr=thr8, scale=scale)
        key = jax.random.PRNGKey(seed) if rng_key is None else rng_key
        bits = jax.random.bits(key, (S, BD), dtype=jnp.uint8)
        inputs = (x2d, pe2d, bits)
        in_specs = [x_spec, pe_spec, pl.BlockSpec((ts, BD), lambda i: (i, 0))]
        x_idx = 0
        bits_bytes = S * BD

    flops = S * BD * (3 if apply_dropout else 1)
    bytes_accessed = (2 * S * BD * itemsize
                      + S * D * pe2d.dtype.itemsize
                      + bits_bytes)
    cost = pl.CostEstimate(flops=flops, transcendentals=0,
                           bytes_accessed=bytes_accessed)

    # Only CORE_PARALLEL actually splits the grid across v7x's two TensorCores;
    # on single-TC chips plain "parallel" is the safe, near-neutral choice.
    dim_sem = (pltpu.CORE_PARALLEL,) if gen == "v7" else ("parallel",)

    out2d = pl.pallas_call(
        kernel,
        out_shape=jax.ShapeDtypeStruct((S, BD), x.dtype),
        grid=grid,
        in_specs=in_specs,
        out_specs=out_spec,
        compiler_params=pltpu.CompilerParams(
            dimension_semantics=dim_sem,
            vmem_limit_bytes=vmem_limit),
        cost_estimate=cost,
        input_output_aliases={x_idx: 0} if donate_x else {},
    )(*inputs)
    return out2d.reshape(S, B, D)


# ----------------------------- demo / check ---------------------------------


if __name__ == "__main__":
    # Small shapes: seq=8, batch=2, d_model=32 (batch_first=False layout).
    S, B, D = 8, 2, 32
    key = jax.random.PRNGKey(0)
    x = jax.random.normal(key, (S, B, D), dtype=jnp.float32)

    pe = make_positional_encoding(D, max_len=5000)
    ref = x + pe[:S]                                  # (S, B, D) reference

    # Eval mode (dropout off) -> must equal x + pe[:S].
    out_eval = jax.block_until_ready(
        positional_encoding_forward(x, pe, p_drop=0.1, training=False))
    assert out_eval.shape == (S, B, D)
    assert jnp.allclose(out_eval, ref, atol=1e-6), "eval-mode mismatch vs reference"

    # Training mode: inverted dropout inside the kernel.  Every output element
    # must be either 0 (dropped) or ref / (1 - p) (kept).
    p = 0.1
    out_train = jax.block_until_ready(
        positional_encoding_forward(x, pe, p_drop=p, training=True, seed=0))
    assert out_train.shape == (S, B, D)
    kept_val = ref * (1.0 / (1.0 - p))
    ok = jnp.isclose(out_train, kept_val, rtol=1e-5, atol=1e-5) | (out_train == 0.0)
    assert bool(jnp.all(ok)), "training-mode output is not {0, (x+pe)/(1-p)}"

    print("KERNEL_OK")
</pallas_src>

<mosaic_0001>
module attributes {stable_mosaic.version = 11 : i64} {
  func.func @_kernel_eval(%arg0: i32, %arg1: memref<8x64xf32, #tpu.memory_space<vmem>>, %arg2: memref<8x32xf32, #tpu.memory_space<vmem>>, %arg3: memref<8x64xf32, #tpu.memory_space<vmem>>) attributes {dimension_semantics = [#tpu.dimension_semantics<parallel>], iteration_bounds = array<i64: 1>, scalar_prefetch = 0 : i64, scratch_operands = 0 : i64, tpu.core_type = #tpu.core_type<tc>, window_params = [{transform_indices = @transform_0, window_bounds = array<i64: 8, 64>}, {transform_indices = @transform_1, window_bounds = array<i64: 8, 32>}, {transform_indices = @transform_2, window_bounds = array<i64: 8, 64>}]} {
    %c0 = arith.constant 0 : index
    %c0_0 = arith.constant 0 : index
    %0 = vector.load %arg2[%c0, %c0_0] : memref<8x32xf32, #tpu.memory_space<vmem>>, vector<8x32xf32>
    %c0_1 = arith.constant 0 : index
    %c0_2 = arith.constant 0 : index
    %1 = vector.load %arg1[%c0_1, %c0_2] : memref<8x64xf32, #tpu.memory_space<vmem>>, vector<8x64xf32>
    %2 = tpu.concatenate %0, %0 in 1 : vector<8x32xf32>, vector<8x32xf32> -> vector<8x64xf32>
    %3 = arith.addf %1, %2 : vector<8x64xf32>
    %c0_3 = arith.constant 0 : index
    %c0_4 = arith.constant 0 : index
    %4 = vector.load %arg3[%c0_3, %c0_4] : memref<8x64xf32, #tpu.memory_space<vmem>>, vector<8x64xf32>
    tpu.vector_store %arg3[%c0_3, %c0_4], %3 {strides = array<i32>} : memref<8x64xf32, #tpu.memory_space<vmem>>, vector<8x64xf32>,
    return
  }
  func.func @transform_0(%arg0: i32) -> (i32, i32) {
    %c0_i32 = arith.constant 0 : i32
    %c0_i32_0 = arith.constant 0 : i32
    return %arg0, %c0_i32 : i32, i32
  }
  func.func @transform_1(%arg0: i32) -> (i32, i32) {
    %c0_i32 = arith.constant 0 : i32
    %c0_i32_0 = arith.constant 0 : i32
    return %arg0, %c0_i32 : i32, i32
  }
  func.func @transform_2(%arg0: i32) -> (i32, i32) {
    %c0_i32 = arith.constant 0 : i32
    %c0_i32_0 = arith.constant 0 : i32
    return %arg0, %c0_i32 : i32, i32
  }
}

</mosaic_0001>

<bundles_post_ra>
// kernel: tpu_custom_call.1
= control target key start
LH: loop header
LB: loop body
LE: loop exit
PB: predicated region body
PF: predicated region fallthrough
CT: control target
= control target key end

     0   :  { %s93_s0 = inlined_call_operand.vmem [shape: f32[8,64], index: 0, kind: input, shape index: {}]   ;;  %s94_s1 = inlined_call_operand.vmem [shape: f32[5000,32], index: 1, kind: input, shape index: {}]   ;;  %s95_s2 = inlined_call_operand.hbm [shape: f32[8,64], index: 2, kind: output, shape index: {}]  }
   0x1   :  { %v12_v0 = vld [vmem:[%s94_s1] sm:$0xff] }
   0x2   :  { %7 = vsyncpa [#allocation3], 0  ;;  %s67_s11 = smov 32   ;;  %vm18_vm0 = vcmask 261120   ;;  %v13_v1 = vld [vmem:[%s93_s0] sm:$0xff]  ;;  %s68_s14 = smov [#allocation2]  }
   0x3   :  { %15 = vrot.lane.b32.xlu0 %v12_v0, %s67_s11  ;;  %s28_s15 = sshll.u32 %s68_s14, 4  ;;  %s30_s18 = sshll.u32 %s95_s2, 4  ;;  %vm21_vm1 = vcmask 523264   ;;  %s29_s15 = int_to_ptr.vmem [resolvable:$true] %s28_s15  ;;  %s31_s18 = int_to_ptr.hbm [resolvable:$true] %s30_s18 }
  0x75   :  { %v16_v2 = vpop.permute.xlu0 %15 }
  0x76   :  { %v19_v3 = vsel %vm18_vm0, %v12_v0, %v16_v2 }
  0x77   :  { %v20_v4 = vadd.f32 %v19_v3, %v13_v1 }
  0x79   :  { %22 = vst.msk [vmem:[#allocation2] sm:$0xff] %vm21_vm1, %v20_v4 }
  0x7a   :  { %33 = dma.vmem_to_hbm [thread:$0]  %s29_s15, 128, %s31_s18, [#allocation3]  }
  0x7b   :  { %65 = dma.done.wait [#allocation3], 128  }
  0x7c   :  { %66 = vsyncadd [#allocation3], 4294967168 }
  0x7d   :  { %38 = vsyncpa [#allocation3], 1 }

</bundles_post_ra>
